<compile_context>
chip_gen: v7x
topology: tpu7x:2x2x1
jax: 0.10.0
libtpu: 0.0.40
codegen_flags: <defaults>
</compile_context>

<pallas_src>
import functools

import jax
import jax.numpy as jnp
from jax import lax
from jax.experimental import pallas as pl
from jax.experimental.pallas import tpu as pltpu


# -----------------------------------------------------------------------------
# Small helpers
# -----------------------------------------------------------------------------
def _gates_to_hc(gates, c_prev, H):
    """PyTorch nn.LSTMCell gate semantics (order i, f, g, o); all math in f32."""
    i = jax.nn.sigmoid(gates[:, 0 * H:1 * H])
    f = jax.nn.sigmoid(gates[:, 1 * H:2 * H])
    g = jnp.tanh(gates[:, 2 * H:3 * H])
    o = jax.nn.sigmoid(gates[:, 3 * H:4 * H])
    c_new = f * c_prev + i * g
    h_new = o * jnp.tanh(c_new)
    return h_new, c_new


_ROLL_IS_JNP_LIKE = None


def _roll_is_jnp_like():
    """Probe pltpu.roll's rotation direction once so the 3-tap conv stencil is robust to
    either convention (we need to know whether roll(x, 1)[:, j] == x[:, j-1])."""
    global _ROLL_IS_JNP_LIKE
    if _ROLL_IS_JNP_LIKE is None:
        def probe(x_ref, o_ref):
            o_ref[...] = pltpu.roll(x_ref[...], 1, axis=1)
        x = jnp.broadcast_to(jnp.arange(128, dtype=jnp.float32), (8, 128))
        y = pl.pallas_call(probe, out_shape=jax.ShapeDtypeStruct((8, 128), jnp.float32))(x)
        _ROLL_IS_JNP_LIKE = bool(jnp.all(y == jnp.roll(x, 1, axis=1)))
    return _ROLL_IS_JNP_LIKE


# -----------------------------------------------------------------------------
# Fused T-step kernel: grid axis 0 = block of Tb decode steps (sequential)
# -----------------------------------------------------------------------------
def topdown_core_kernel(
    # SMEM scalars: [conv_w0, conv_w1, conv_w2, conv_b]
    conv_ref,
    # activations
    xt_ref, fc_ref, att_ref, pre_att_ref, h0_ref, c0_ref,
    # att-LSTM weights (pre-transposed + split; bias pre-summed, f32)
    w_hl_att_ref, w_fc_att_ref, w_x_att_ref, w_hh_att_ref, b_att_ref,
    # lang-LSTM weights
    w_w_lang_ref, w_h_lang_ref, w_hh_lang_ref, b_lang_ref,
    # attention + logit weights
    h2att_w_ref, h2att_b_ref, alpha_w_ref, alpha_b_ref, logit_w_ref, logit_b_ref,
    # outputs
    out_logits_ref, out_h_ref, out_c_ref, out_alpha_ref,
    # static: pltpu.roll shifts realizing the j-1 / j+1 lane neighbours
    *, shift_prev, shift_next,
):
    t = pl.program_id(0)
    Tb = xt_ref.shape[0]
    Bp, L, H = att_ref.shape

    # Load the initial recurrent state into the VMEM-resident output refs once.
    @pl.when(t == 0)
    def _init():
        out_h_ref[...] = h0_ref[...]
        out_c_ref[...] = c0_ref[...]

    # Hoisted, loop-invariant loads / constants (don't re-broadcast inside the loop).
    fc = fc_ref[...]                          # (Bp, H)
    att = att_ref[...]                        # (Bp, L, H)
    pre_att = pre_att_ref[...]                # (Bp, L, A) = v2att(att_feats) + bias
    b_att = b_att_ref[...]
    b_lang = b_lang_ref[...]
    h2att_b = h2att_b_ref[...]
    alpha_w = alpha_w_ref[...]
    alpha_b = alpha_b_ref[...]
    logit_b = logit_b_ref[...]
    w0 = conv_ref[0]
    w1 = conv_ref[1]
    w2 = conv_ref[2]
    conv_b = conv_ref[3]
    col = lax.broadcasted_iota(jnp.int32, (Bp, H), 1)
    mask_prev = col > 0            # zero the wrapped lane of the j-1 neighbour
    mask_next = col < H - 1        # zero the wrapped lane of the j+1 neighbour

    wdt = w_hh_att_ref.dtype       # MXU operand dtype (f32 or bf16); accumulation is f32

    def fdot(x, w_ref):
        return jnp.dot(x.astype(wdt), w_ref[...], preferred_element_type=jnp.float32)

    def step(i, carry):
        h_att, h_lang, c_att, c_lang = carry
        xt = xt_ref[i]                                              # (Bp, E)

        # ---- att LSTM: cat([h_lang, fc, xt]) as a sum of split matmuls --------
        gates_att = (fdot(h_lang, w_hl_att_ref) + fdot(fc, w_fc_att_ref)
                     + fdot(xt, w_x_att_ref) + fdot(h_att, w_hh_att_ref) + b_att)
        h_att, c_att = _gates_to_hc(gates_att, c_att, H)

        # ---- filter_h: Conv1d(1,1,3,padding=1)+ReLU as a 3-tap lane stencil ---
        prev_lane = jnp.where(mask_prev, pltpu.roll(h_att, shift_prev, axis=1), 0.0)
        next_lane = jnp.where(mask_next, pltpu.roll(h_att, shift_next, axis=1), 0.0)
        filt = jnp.maximum(w1 * h_att + w0 * prev_lane + w2 * next_lane + conv_b, 0.0)

        # ---- TopDownAttention: additive (tanh) attention + softmax over L -----
        att_h = fdot(filt, h2att_w_ref) + h2att_b                   # (Bp, A)
        att_act = jnp.tanh(pre_att + att_h[:, None, :])             # (Bp, L, A)
        scores = jnp.sum(att_act * alpha_w, axis=-1) + alpha_b      # (Bp, L)
        scores = scores - jnp.max(scores, axis=-1, keepdims=True)
        p = jnp.exp(scores)
        alpha = p * pl.reciprocal(jnp.sum(p, axis=-1, keepdims=True), approx=True)
        weighted = jnp.sum(att * alpha[:, :, None], axis=1)         # (Bp, H)

        # ---- lang LSTM: cat([weighted, h_att]) as split matmuls ---------------
        gates_lang = (fdot(weighted, w_w_lang_ref) + fdot(h_att, w_h_lang_ref)
                      + fdot(h_lang, w_hh_lang_ref) + b_lang)
        h_lang, c_lang = _gates_to_hc(gates_lang, c_lang, H)

        # TODO(synk): F.dropout in training mode is omitted; eval-mode (identity) only.
        logits = fdot(h_lang, logit_w_ref) + logit_b                # (Bp, V)

        out_logits_ref[i] = logits
        out_alpha_ref[t * Tb + i] = alpha
        return h_att, h_lang, c_att, c_lang

    carry = (out_h_ref[0], out_h_ref[1], out_c_ref[0], out_c_ref[1])
    h_att, h_lang, c_att, c_lang = lax.fori_loop(0, Tb, step, carry, unroll=True)

    out_h_ref[0] = h_att
    out_h_ref[1] = h_lang
    out_c_ref[0] = c_att
    out_c_ref[1] = c_lang


# -----------------------------------------------------------------------------
# Host-side parameter preparation (pre-transpose / split / cast -- done once)
# -----------------------------------------------------------------------------
def prepare_params(p, E, H, weight_dtype=jnp.float32):
    w_ih_att = p["w_ih_att"]                   # (4H, E+2H), torch layout
    w_ih_lang = p["w_ih_lang"]                 # (4H, 2H)
    wt = lambda a: a.T.astype(weight_dtype)    # pre-transpose + MXU operand dtype
    f32 = lambda a: a.astype(jnp.float32)
    return {
        "w_hl_att": wt(w_ih_att[:, 0:H]),              # (H, 4H)  for prev_h_lang
        "w_fc_att": wt(w_ih_att[:, H:2 * H]),          # (H, 4H)  for fc_feats
        "w_x_att": wt(w_ih_att[:, 2 * H:]),            # (E, 4H)  for xt
        "w_hh_att": wt(p["w_hh_att"]),                 # (H, 4H)
        "b_att": f32(p["b_ih_att"] + p["b_hh_att"]),   # (1, 4H)
        "w_w_lang": wt(w_ih_lang[:, 0:H]),             # (H, 4H)  for weighted feats
        "w_h_lang": wt(w_ih_lang[:, H:]),              # (H, 4H)  for next_h_att
        "w_hh_lang": wt(p["w_hh_lang"]),               # (H, 4H)
        "b_lang": f32(p["b_ih_lang"] + p["b_hh_lang"]),
        "h2att_w": wt(p["h2att_w"]),                   # (H, A)
        "h2att_b": f32(p["h2att_b"]),                  # (1, A)
        "alpha_w": f32(p["alpha_w"]),                  # (1, A)  VPU multiply, keep f32
        "alpha_b": f32(p["alpha_b"]),                  # (1, 1)
        "logit_w": wt(p["logit_w"]),                   # (H, V)
        "logit_b": f32(p["logit_b"]),                  # (1, V)
    }


def _pad_batch(a, axis, Bp):
    B = a.shape[axis]
    if B == Bp:
        return a
    widths = [(0, 0)] * a.ndim
    widths[axis] = (0, Bp - B)
    return jnp.pad(a, widths)


# -----------------------------------------------------------------------------
# Host wrapper: fused T-step decode (teacher-forced xt sequence)
# -----------------------------------------------------------------------------
def topdown_core_fused(xt_seq, fc_feats, att_feats, h_state, c_state, params,
                       *, time_block=4, weight_dtype=jnp.float32):
    T, B, E = xt_seq.shape
    H = h_state.shape[-1]
    L = att_feats.shape[1]
    A = params["h2att_w"].shape[0]
    V = params["logit_w"].shape[0]

    Bp = max(8, ((B + 7) // 8) * 8)                  # pad batch to the f32 sublane tile
    Tb = max(d for d in range(1, min(time_block, T) + 1) if T % d == 0)

    xt_p = _pad_batch(xt_seq, 1, Bp)
    fc_p = _pad_batch(fc_feats, 0, Bp)
    att_p = _pad_batch(att_feats, 0, Bp)
    h0_p = _pad_batch(h_state, 1, Bp)
    c0_p = _pad_batch(c_state, 1, Bp)

    kp = prepare_params(params, E, H, weight_dtype)

    # Time-invariant v2att projection of att_feats: once, by XLA (full-height MXU tiles).
    pre_att = (jnp.einsum("blh,ah->bla", att_p, params["v2att_w"])
               + params["v2att_b"]).astype(jnp.float32)              # (Bp, L, A)

    # Conv1d(1,1,3,padding=1) taps + bias as SMEM scalars.
    conv_scalars = jnp.concatenate([params["conv_w"].astype(jnp.float32),
                                    params["conv_b"].astype(jnp.float32)])  # (4,)

    if _roll_is_jnp_like():
        shift_prev, shift_next = 1, H - 1     # roll(x, 1)[:, j] == x[:, j-1]
    else:
        shift_prev, shift_next = H - 1, 1

    kernel = functools.partial(topdown_core_kernel,
                               shift_prev=shift_prev, shift_next=shift_next)

    def run(single_buffer):
        def vspec(shape):                     # full-array block, constant index map
            nd = len(shape)
            kw = dict(pipeline_mode=pl.Buffered(1)) if single_buffer else {}
            return pl.BlockSpec(shape, lambda *_: (0,) * nd, **kw)

        in_specs = [
            pl.BlockSpec(memory_space=pltpu.MemorySpace.SMEM),   # conv scalars
            pl.BlockSpec((Tb, Bp, E), lambda t: (t, 0, 0)),      # xt (streamed Tb-block)
            vspec((Bp, H)),                                      # fc
            vspec((Bp, L, H)),                                   # att_feats
            vspec((Bp, L, A)),                                   # pre_att (v2att proj)
            vspec((2, Bp, H)), vspec((2, Bp, H)),                # h0, c0
            vspec((H, 4 * H)), vspec((H, 4 * H)), vspec((E, 4 * H)),
            vspec((H, 4 * H)), vspec((1, 4 * H)),                # att-LSTM
            vspec((H, 4 * H)), vspec((H, 4 * H)), vspec((H, 4 * H)),
            vspec((1, 4 * H)),                                   # lang-LSTM
            vspec((H, A)), vspec((1, A)), vspec((1, A)), vspec((1, 1)),   # attention
            vspec((H, V)), vspec((1, V)),                        # logit
        ]
        out_shape = (
            jax.ShapeDtypeStruct((T, Bp, V), jnp.float32),       # logits per step
            jax.ShapeDtypeStruct((2, Bp, H), jnp.float32),       # final stacked h
            jax.ShapeDtypeStruct((2, Bp, H), jnp.float32),       # final stacked c
            jax.ShapeDtypeStruct((T, Bp, L), jnp.float32),       # attention weights
        )
        out_specs = (
            pl.BlockSpec((Tb, Bp, V), lambda t: (t, 0, 0)),      # lane-dense streamed
            pl.BlockSpec((2, Bp, H), lambda t: (0, 0, 0)),       # VMEM-resident h carry
            pl.BlockSpec((2, Bp, H), lambda t: (0, 0, 0)),       # VMEM-resident c carry
            pl.BlockSpec((T, Bp, L), lambda t: (0, 0, 0)),       # resident alpha, 1 wb
        )
        out = pl.pallas_call(
            kernel,
            out_shape=out_shape,
            grid=(T // Tb,),
            in_specs=in_specs,
            out_specs=out_specs,
            compiler_params=pltpu.CompilerParams(
                dimension_semantics=("arbitrary",)),             # sequential decode
        )(conv_scalars, xt_p, fc_p, att_p, pre_att, h0_p, c0_p,
          kp["w_hl_att"], kp["w_fc_att"], kp["w_x_att"], kp["w_hh_att"], kp["b_att"],
          kp["w_w_lang"], kp["w_h_lang"], kp["w_hh_lang"], kp["b_lang"],
          kp["h2att_w"], kp["h2att_b"], kp["alpha_w"], kp["alpha_b"],
          kp["logit_w"], kp["logit_b"])
        return jax.block_until_ready(out)

    try:
        logits, h_new, c_new, alpha = run(single_buffer=True)
    except Exception:
        # Fallback if this build rejects pipeline_mode=pl.Buffered(1) on inputs.
        logits, h_new, c_new, alpha = run(single_buffer=False)

    return logits[:, :B], h_new[:, :B], c_new[:, :B], alpha[:, :B]


# -----------------------------------------------------------------------------
# Pure-JAX reference (torch-layout params), single step + python time loop
# -----------------------------------------------------------------------------
def _lstm_cell_ref(x, h, c, w_ih, w_hh, b_ih, b_hh):
    gates = x @ w_ih.T + b_ih + h @ w_hh.T + b_hh
    H = h.shape[-1]
    i = jax.nn.sigmoid(gates[:, 0 * H:1 * H])
    f = jax.nn.sigmoid(gates[:, 1 * H:2 * H])
    g = jnp.tanh(gates[:, 2 * H:3 * H])
    o = jax.nn.sigmoid(gates[:, 3 * H:4 * H])
    c_new = f * c + i * g
    return o * jnp.tanh(c_new), c_new


def topdown_core_ref(xt, fc_feats, att_feats, h_state, c_state, p):
    prev_h_att, prev_h_lang = h_state[0], h_state[1]
    prev_c_att, prev_c_lang = c_state[0], c_state[1]

    x_att = jnp.concatenate([prev_h_lang, fc_feats, xt], axis=1)
    h1, c1 = _lstm_cell_ref(x_att, prev_h_att, prev_c_att,
                            p["w_ih_att"], p["w_hh_att"], p["b_ih_att"], p["b_hh_att"])

    pad = jnp.pad(h1, ((0, 0), (1, 1)))
    filt = (p["conv_w"][0] * pad[:, :-2] + p["conv_w"][1] * pad[:, 1:-1]
            + p["conv_w"][2] * pad[:, 2:] + p["conv_b"][0])
    filt = jnp.maximum(filt, 0.0)

    att_v = jnp.einsum("blh,ah->bla", att_feats, p["v2att_w"]) + p["v2att_b"]
    att_h = filt @ p["h2att_w"].T + p["h2att_b"]
    act = jnp.tanh(att_v + att_h[:, None, :])
    scores = (jnp.einsum("bla,oa->blo", act, p["alpha_w"]) + p["alpha_b"])[..., 0]
    alpha = jax.nn.softmax(scores, axis=1)
    weighted = jnp.sum(att_feats * alpha[:, :, None], axis=1)

    x_lang = jnp.concatenate([weighted, h1], axis=1)
    h2, c2 = _lstm_cell_ref(x_lang, prev_h_lang, prev_c_lang,
                            p["w_ih_lang"], p["w_hh_lang"], p["b_ih_lang"], p["b_hh_lang"])

    logits = h2 @ p["logit_w"].T + p["logit_b"]
    return logits, jnp.stack([h1, h2]), jnp.stack([c1, c2]), alpha


def topdown_core_ref_seq(xt_seq, fc_feats, att_feats, h0, c0, p):
    h, c = h0, c0
    logits_all, alpha_all = [], []
    for t in range(xt_seq.shape[0]):
        logits, h, c, alpha = topdown_core_ref(xt_seq[t], fc_feats, att_feats, h, c, p)
        logits_all.append(logits)
        alpha_all.append(alpha)
    return jnp.stack(logits_all), h, c, jnp.stack(alpha_all)


# -----------------------------------------------------------------------------
# Deterministic parameter init (orthogonal LSTM weights, per _init_weights)
# -----------------------------------------------------------------------------
def _orthogonal(key, shape):
    a = jax.random.normal(key, shape, jnp.float32)
    tall = shape[0] >= shape[1]
    q, r = jnp.linalg.qr(a if tall else a.T)
    q = q * jnp.sign(jnp.diagonal(r))
    return (q if tall else q.T).astype(jnp.float32)


def make_params(key, E, H, A, V):
    ks = jax.random.split(key, 16)
    nrm = lambda k, s: 0.1 * jax.random.normal(k, s, jnp.float32)
    return {
        "w_ih_att": _orthogonal(ks[0], (4 * H, E + 2 * H)),
        "w_hh_att": _orthogonal(ks[1], (4 * H, H)),
        "b_ih_att": nrm(ks[2], (1, 4 * H)),
        "b_hh_att": nrm(ks[3], (1, 4 * H)),
        "w_ih_lang": _orthogonal(ks[4], (4 * H, 2 * H)),
        "w_hh_lang": _orthogonal(ks[5], (4 * H, H)),
        "b_ih_lang": nrm(ks[6], (1, 4 * H)),
        "b_hh_lang": nrm(ks[7], (1, 4 * H)),
        "conv_w": nrm(ks[8], (3,)),
        "conv_b": nrm(ks[9], (1,)),
        "h2att_w": nrm(ks[10], (A, H)),
        "h2att_b": jnp.zeros((1, A), jnp.float32),
        "v2att_w": nrm(ks[11], (A, H)),
        "v2att_b": jnp.zeros((1, A), jnp.float32),
        "alpha_w": nrm(ks[12], (1, A)),
        "alpha_b": jnp.zeros((1, 1), jnp.float32),
        "logit_w": nrm(ks[13], (V, H)),
        "logit_b": jnp.zeros((1, V), jnp.float32),
    }


# -----------------------------------------------------------------------------
if __name__ == "__main__":
    # Lane-friendly small shapes: H/A/E multiples of 128, V multiple of 128.
    B, E, H, A, L, V, T = 2, 128, 128, 128, 8, 512, 8

    key = jax.random.PRNGKey(0)
    ks = jax.random.split(key, 6)

    xt_seq = jax.random.normal(ks[0], (T, B, E), jnp.float32)     # teacher-forced embeds
    fc_feats = jax.random.normal(ks[1], (B, H), jnp.float32)
    att_feats = jax.random.normal(ks[2], (B, L, H), jnp.float32)
    h_state = jax.random.normal(ks[3], (2, B, H), jnp.float32)    # [h_att, h_lang]
    c_state = jax.random.normal(ks[4], (2, B, H), jnp.float32)    # [c_att, c_lang]
    params = make_params(ks[5], E, H, A, V)

    # Reference first (inputs untouched), then the fused kernel.
    ref = topdown_core_ref_seq(xt_seq, fc_feats, att_feats, h_state, c_state, params)

    # f32 weights (v5e-safe path): tight check vs the pure-JAX reference.
    outs = topdown_core_fused(xt_seq, fc_feats, att_feats, h_state, c_state, params,
                              time_block=4, weight_dtype=jnp.float32)
    outs = jax.block_until_ready(outs)
    for got, want in zip(outs, ref):
        assert got.shape == want.shape, (got.shape, want.shape)
        assert jnp.allclose(got, want, atol=1e-2, rtol=1e-2), "f32 mismatch vs reference"

    # bf16 weights (v6e/v7x MXU path; f32 accumulation + elementwise): loose sanity check.
    outs_bf16 = topdown_core_fused(xt_seq, fc_feats, att_feats, h_state, c_state, params,
                                   time_block=4, weight_dtype=jnp.bfloat16)
    outs_bf16 = jax.block_until_ready(outs_bf16)
    for got, want in zip(outs_bf16, ref):
        assert got.shape == want.shape, (got.shape, want.shape)
        assert jnp.allclose(got, want, atol=1e-1, rtol=1e-1), "bf16 mismatch vs reference"

    print("KERNEL_OK")
</pallas_src>

<mosaic_0001>
module attributes {stable_mosaic.version = 11 : i64} {
  func.func @probe(%arg0: memref<8x128xf32, #tpu.memory_space<vmem>>, %arg1: memref<8x128xf32, #tpu.memory_space<vmem>>) attributes {dimension_semantics = [], scalar_prefetch = 0 : i64, scratch_operands = 0 : i64, tpu.core_type = #tpu.core_type<tc>} {
    %c0 = arith.constant 0 : index
    %c0_0 = arith.constant 0 : index
    %0 = vector.load %arg0[%c0, %c0_0] : memref<8x128xf32, #tpu.memory_space<vmem>>, vector<8x128xf32>
    %c1_i32 = arith.constant 1 : i32
    %1 = tpu.dynamic_rotate %0 by %c1_i32 dim 1 : vector<8x128xf32>, i32 -> vector<8x128xf32>
    %c0_1 = arith.constant 0 : index
    %c0_2 = arith.constant 0 : index
    %2 = vector.load %arg1[%c0_1, %c0_2] : memref<8x128xf32, #tpu.memory_space<vmem>>, vector<8x128xf32>
    tpu.vector_store %arg1[%c0_1, %c0_2], %1 {strides = array<i32>} : memref<8x128xf32, #tpu.memory_space<vmem>>, vector<8x128xf32>,
    return
  }
}

</mosaic_0001>

<bundles_post_ra>
// kernel: tpu_custom_call.1
= control target key start
LH: loop header
LB: loop body
LE: loop exit
PB: predicated region body
PF: predicated region fallthrough
CT: control target
= control target key end

     0   :  { %6 = vsyncpa [#allocation3], 0  ;;  %s128_s0 = inlined_call_operand.hbm [shape: f32[8,128], index: 0, kind: input, shape index: {}]   ;;  %s129_s1 = inlined_call_operand.hbm [shape: f32[8,128], index: 1, kind: output, shape index: {}]  }
   0x1   :  { %7 = vsyncpa [#allocation4], 0  ;;  %s91_s6 = smov [#allocation2]   ;;  %s43_s10 = scalar_lea.hbm %s128_s0, 128 }
   0x2   :  { %s14_s7 = sshll.u32 %s91_s6, 4  ;;  %p44_p0 = scmp.ne.s32.totalorder %s128_s0, %s43_s10  ;;  %s15_s7 = int_to_ptr.vmem [resolvable:$true] %s14_s7 }
   0x3   :  { %p47_p1 = scmp.lt.u32.totalorder %s43_s10, %s128_s0 }
   0x5   :  { %p49_p2 = pnand %p47_p1, %p44_p0 }
   0x7   :  { %52 = shalt.err (!%p49_p2)
}
   0x8   :  { %s53_s15 = scalar_lea.vmem %s15_s7, 128  ;;  %p58_p4 = scmp.lt.s32.totalorder %s15_s7, %s15_s7 }
   0x9   :  { %p54_p3 = scmp.ne.s32.totalorder %s15_s7, %s53_s15  ;;  %p59_p5 = scmp.lt.s32.totalorder %s53_s15, %s53_s15 }
   0xb   :  { %p60_p6 = por %p59_p5, %p58_p4 }
   0xd   :  { %p61_p7 = pnand %p60_p6, %p54_p3 }
   0xf   :  { %64 = shalt.err (!%p61_p7)
}
  0x10   :  { %17 = dma.hbm_to_vmem [thread:$0]  %s128_s0, 128, %s15_s7, [#allocation3]  }
  0x11   :  { %87 = dma.done.wait [#allocation3], 128  }
  0x12   :  { %88 = vsyncadd [#allocation3], 4294967168  ;;  %v21_v0 = vld [vmem:[#allocation2] sm:$0xff]  ;;  %s92_s18 = smov 1   ;;  %s93_s19 = smov [#allocation5]  }
  0x13   :  { %22 = vrot.lane.b32.xlu0 %v21_v0, %s92_s18  ;;  %s31_s20 = sshll.u32 %s93_s19, 4  ;;  %s32_s20 = int_to_ptr.vmem [resolvable:$true] %s31_s20 }
  0x14   :  { %s65_s21 = scalar_lea.vmem %s32_s20, 128  ;;  %p70_p9 = scmp.lt.s32.totalorder %s32_s20, %s32_s20 }
  0x15   :  { %p66_p8 = scmp.ne.s32.totalorder %s32_s20, %s65_s21  ;;  %p71_p10 = scmp.lt.s32.totalorder %s65_s21, %s65_s21 }
  0x17   :  { %p72_p11 = por %p71_p10, %p70_p9 }
  0x19   :  { %p73_p12 = pnand %p72_p11, %p66_p8 }
  0x85   :  { %v23_v1 = vpop.permute.xlu0 %22 }
  0x86   :  { %24 = vst [vmem:[#allocation5] sm:$0xff] %v23_v1 }
  0x87   :  { %76 = shalt.err (!%p73_p12)
}
  0x88   :  { %s77_s0 = scalar_lea.hbm %s129_s1, 128 }
  0x89   :  { %p78_p13 = scmp.ne.s32.totalorder %s129_s1, %s77_s0  ;;  %p81_p0 = scmp.lt.u32.totalorder %s77_s0, %s129_s1 }
  0x8b   :  { %p83_p1 = pnand %p81_p0, %p78_p13 }
  0x8d   :  { %86 = shalt.err (!%p83_p1)
}
  0x8e   :  { %34 = dma.vmem_to_hbm [thread:$0]  %s32_s20, 128, %s129_s1, [#allocation4]  }
  0x8f   :  { %89 = dma.done.wait [#allocation4], 128  }
  0x90   :  { %90 = vsyncadd [#allocation4], 4294967168 }
  0x91   :  { %38 = vsyncpa [#allocation3], 1 }
  0x92   :  { %39 = vsyncpa [#allocation4], 1 }

</bundles_post_ra>
